<compile_context>
chip_gen: v5e
topology: v5e:2x2
jax: 0.10.0
libtpu: 0.0.40
codegen_flags: <defaults>
</compile_context>

<pallas_src>
import functools

import jax
import jax.numpy as jnp
from jax.experimental import pallas as pl
from jax.experimental.pallas import tpu as pltpu


def _analog_gcn_kernel(xt_ref, wfull_ref, bfull_ref, wmix_ref, bmix_ref,
                       x_out_ref, z_out_ref, col_ref, *,
                       shifts, c_in, out_ch, bt_pad):
    # Zero-init the im2col scratch so the (later cropped) tail lanes of each
    # shifted block are finite and deterministic.
    col_ref[...] = jnp.zeros_like(col_ref)

    x = xt_ref[...]                                      # (C_in, BT_pad), f32

    # Materialize the time-shifted copies of x once (static unroll over taps).
    for i, s in enumerate(shifts):
        col_ref[i * c_in:(i + 1) * c_in, 0:bt_pad - s] = x[:, s:bt_pad]

    # One fused MXU push for conv-a, conv-b and res; bias via VPU broadcast.
    fused = jnp.dot(wfull_ref[...], col_ref[...],
                    preferred_element_type=jnp.float32) + bfull_ref[...]

    g_a = fused[:out_ch, :]
    g_b = fused[out_ch:2 * out_ch, :]        # "b" half, pre-scaled by 0.5
    x_res = fused[2 * out_ch:, :]

    # Gated activation: tanh(a) * sigmoid(b), with sigmoid(v) = 0.5*tanh(v/2)+0.5
    # (the /2 already folded into the weights) -> two EUP tanh's total.
    gated = jnp.tanh(g_a) * (0.5 * jnp.tanh(g_b) + 0.5)
    z_out_ref[...] = gated.astype(z_out_ref.dtype)

    # mix: 1x1 conv (with bias) on the gated activations, then residual add.
    mixed = jnp.dot(wmix_ref[...], gated,
                    preferred_element_type=jnp.float32)
    x_out_ref[...] = (mixed + (bmix_ref[...] + x_res)).astype(x_out_ref.dtype)


@functools.partial(jax.jit,
                   static_argnames=("kernel_size", "dilation", "causal"))
def analog_gcn_block(x, w1, b1, wmix, bmix, wres, *,
                     kernel_size, dilation, causal):
    """x: (B, C_in, T); returns (x_out, z) each (B, C_out, T_out)."""
    B, C_in, T = x.shape
    out_ch = wres.shape[0]
    crop = dilation * (kernel_size - 1)
    t_out = T - crop
    res_start = crop if causal else crop // 2

    # Time shifts needed: one per conv tap, plus the res-crop offset.  The res
    # path reuses an existing tap block when the offsets coincide (always true
    # for causal: res_start == (K-1)*dilation).
    shifts = [k * dilation for k in range(kernel_size)]
    if res_start in shifts:
        res_block = shifts.index(res_start)
    else:
        res_block = len(shifts)
        shifts.append(res_start)
    n_blocks = len(shifts)
    n_cols = n_blocks * C_in

    # Stacked weights / bias (built once, constant-folded under jit).  The "b"
    # half is pre-scaled by 0.5 so the in-kernel sigmoid is a single tanh.
    half = jnp.concatenate([jnp.ones((out_ch, 1), jnp.float32),
                            jnp.full((out_ch, 1), 0.5, jnp.float32)], axis=0)
    wfull = jnp.zeros((3 * out_ch, n_cols), jnp.float32)
    for k in range(kernel_size):
        wfull = wfull.at[:2 * out_ch, k * C_in:(k + 1) * C_in].set(
            half * w1[k].astype(jnp.float32))
    wfull = wfull.at[2 * out_ch:, res_block * C_in:(res_block + 1) * C_in].set(
        wres.astype(jnp.float32))
    bfull = jnp.concatenate([half * b1.astype(jnp.float32),
                             jnp.zeros((out_ch, 1), jnp.float32)], axis=0)

    # Fold batch into the lane axis and pad to a multiple of 128 lanes so all
    # vector loads/stores are lane-dense (layout plumbing).
    bt = B * T
    bt_pad = ((bt + 127) // 128) * 128
    xt = jnp.transpose(x, (1, 0, 2)).reshape(C_in, bt).astype(jnp.float32)
    if bt_pad != bt:
        xt = jnp.pad(xt, ((0, 0), (0, bt_pad - bt)))

    kern = functools.partial(_analog_gcn_kernel, shifts=tuple(shifts),
                             c_in=C_in, out_ch=out_ch, bt_pad=bt_pad)

    def vmem_spec():
        return pl.BlockSpec(memory_space=pltpu.MemorySpace.VMEM)

    x_f, z_f = pl.pallas_call(
        kern,
        out_shape=(jax.ShapeDtypeStruct((out_ch, bt_pad), jnp.float32),
                   jax.ShapeDtypeStruct((out_ch, bt_pad), jnp.float32)),
        in_specs=[vmem_spec() for _ in range(5)],
        out_specs=(vmem_spec(), vmem_spec()),
        scratch_shapes=[pltpu.VMEM((n_cols, bt_pad), jnp.float32)],
    )(xt, wfull, bfull, wmix.astype(jnp.float32), bmix.astype(jnp.float32))

    # Un-fold and crop to the valid-conv length (layout plumbing); the garbage
    # tail lanes of each batch segment never reach the returned tensors.
    def unfold(y):
        return (y[:, :bt].reshape(out_ch, B, T).transpose(1, 0, 2)
                [:, :, :t_out].astype(x.dtype))

    return unfold(x_f), unfold(z_f)


def _reference(x, w1, b1, wmix, bmix, wres, *, kernel_size, dilation, causal):
    """Pure-JAX reference mirroring the PyTorch forward."""
    B, C_in, T = x.shape
    out_ch = wres.shape[0]
    t_out = T - dilation * (kernel_size - 1)
    acc = jnp.zeros((B, 2 * out_ch, t_out), jnp.float32)
    for k in range(kernel_size):
        xs = x[:, :, k * dilation:k * dilation + t_out]
        acc = acc + jnp.einsum('oc,bct->bot', w1[k], xs)
    acc = acc + b1[None, :, :]
    z = jnp.tanh(acc[:, :out_ch]) * jax.nn.sigmoid(acc[:, out_ch:])
    mixed = jnp.einsum('oc,bct->bot', wmix, z) + bmix[None, :, :]
    x_res_full = jnp.einsum('oc,bct->bot', wres, x)
    crop = T - t_out
    start = crop if causal else crop // 2
    x_res = x_res_full[:, :, start:start + t_out]
    return mixed + x_res, z


if __name__ == "__main__":
    def run_case(n_inp, n_output, kernel_size, dilation, causal, B, T):
        key = jax.random.PRNGKey(0)
        k_x, k_w1, k_b1, k_wm, k_bm, k_wr = jax.random.split(key, 6)

        x = jax.random.normal(k_x, (B, n_inp, T), jnp.float32)
        # conv1 (dilated) weights, (K, 2*C_out, C_in)
        w1 = 0.1 * jax.random.normal(
            k_w1, (kernel_size, 2 * n_output, n_inp), jnp.float32)
        b1 = 0.1 * jax.random.normal(k_b1, (2 * n_output, 1), jnp.float32)
        # mix: 1x1 conv (C_out -> C_out), bias=True
        wmix = 0.1 * jax.random.normal(k_wm, (n_output, n_output), jnp.float32)
        bmix = 0.1 * jax.random.normal(k_bm, (n_output, 1), jnp.float32)
        # res: 1x1 conv (C_in -> C_out), bias=False
        wres = 0.1 * jax.random.normal(k_wr, (n_output, n_inp), jnp.float32)

        x_out, z_out = analog_gcn_block(
            x, w1, b1, wmix, bmix, wres,
            kernel_size=kernel_size, dilation=dilation, causal=causal)
        jax.block_until_ready((x_out, z_out))

        x_ref, z_ref = _reference(
            x, w1, b1, wmix, bmix, wres,
            kernel_size=kernel_size, dilation=dilation, causal=causal)

        assert x_out.shape == x_ref.shape and z_out.shape == z_ref.shape
        assert jnp.allclose(x_out, x_ref, atol=1e-4, rtol=1e-4)
        assert jnp.allclose(z_out, z_ref, atol=1e-4, rtol=1e-4)

    # Matches the original module config (causal; res crop fuses into last tap).
    run_case(n_inp=4, n_output=8, kernel_size=3, dilation=2,
             causal=True, B=2, T=64)
    # Non-causal case where the res crop needs its own shifted block.
    run_case(n_inp=4, n_output=8, kernel_size=2, dilation=3,
             causal=False, B=2, T=64)

    print("KERNEL_OK")
</pallas_src>

<mosaic_0001>
module attributes {stable_mosaic.version = 11 : i64} {
  func.func @_analog_gcn_kernel(%arg0: memref<4x128xf32, #tpu.memory_space<vmem>>, %arg1: memref<24x12xf32, #tpu.memory_space<vmem>>, %arg2: memref<24x1xf32, #tpu.memory_space<vmem>>, %arg3: memref<8x8xf32, #tpu.memory_space<vmem>>, %arg4: memref<8x1xf32, #tpu.memory_space<vmem>>, %arg5: memref<8x128xf32, #tpu.memory_space<vmem>>, %arg6: memref<8x128xf32, #tpu.memory_space<vmem>>, %arg7: memref<12x128xf32, #tpu.memory_space<vmem>>) attributes {dimension_semantics = [], scalar_prefetch = 0 : i64, scratch_operands = 1 : i64, tpu.core_type = #tpu.core_type<tc>} {
    %cst = arith.constant 0.000000e+00 : f32
    %0 = vector.broadcast %cst : f32 to vector<12x128xf32>
    %c0 = arith.constant 0 : index
    %c0_0 = arith.constant 0 : index
    %1 = vector.load %arg7[%c0, %c0_0] : memref<12x128xf32, #tpu.memory_space<vmem>>, vector<12x128xf32>
    tpu.vector_store %arg7[%c0, %c0_0], %0 {strides = array<i32>} : memref<12x128xf32, #tpu.memory_space<vmem>>, vector<12x128xf32>,
    %c0_1 = arith.constant 0 : index
    %c0_2 = arith.constant 0 : index
    %2 = vector.load %arg0[%c0_1, %c0_2] : memref<4x128xf32, #tpu.memory_space<vmem>>, vector<4x128xf32>
    %c0_3 = arith.constant 0 : index
    %c0_4 = arith.constant 0 : index
    %3 = vector.load %arg7[%c0_3, %c0_4] : memref<12x128xf32, #tpu.memory_space<vmem>>, vector<4x128xf32>
    tpu.vector_store %arg7[%c0_3, %c0_4], %2 {strides = array<i32>} : memref<12x128xf32, #tpu.memory_space<vmem>>, vector<4x128xf32>,
    %4 = vector.extract_strided_slice %2 {offsets = [0, 2], sizes = [4, 126], strides = [1, 1]} : vector<4x128xf32> to vector<4x126xf32>
    %c4 = arith.constant 4 : index
    %c0_5 = arith.constant 0 : index
    %5 = vector.load %arg7[%c4, %c0_5] : memref<12x128xf32, #tpu.memory_space<vmem>>, vector<4x126xf32>
    tpu.vector_store %arg7[%c4, %c0_5], %4 {strides = array<i32>} : memref<12x128xf32, #tpu.memory_space<vmem>>, vector<4x126xf32>,
    %6 = vector.extract_strided_slice %2 {offsets = [0, 4], sizes = [4, 124], strides = [1, 1]} : vector<4x128xf32> to vector<4x124xf32>
    %c8 = arith.constant 8 : index
    %c0_6 = arith.constant 0 : index
    %7 = vector.load %arg7[%c8, %c0_6] : memref<12x128xf32, #tpu.memory_space<vmem>>, vector<4x124xf32>
    tpu.vector_store %arg7[%c8, %c0_6], %6 {strides = array<i32>} : memref<12x128xf32, #tpu.memory_space<vmem>>, vector<4x124xf32>,
    %c0_7 = arith.constant 0 : index
    %c0_8 = arith.constant 0 : index
    %8 = vector.load %arg1[%c0_7, %c0_8] : memref<24x12xf32, #tpu.memory_space<vmem>>, vector<24x12xf32>
    %c0_9 = arith.constant 0 : index
    %c0_10 = arith.constant 0 : index
    %9 = vector.load %arg7[%c0_9, %c0_10] : memref<12x128xf32, #tpu.memory_space<vmem>>, vector<12x128xf32>
    %cst_11 = arith.constant dense<0.000000e+00> : vector<24x128xf32>
    %10 = tpu.matmul %8, %9, %cst_11 {dimension_numbers = #tpu.dot_dimension_numbers<[1], [0], [0], [1], [0, 0, 1, 1], [], []>} : vector<24x12xf32>, vector<12x128xf32>, vector<24x128xf32> -> vector<24x128xf32>
    %c0_12 = arith.constant 0 : index
    %c0_13 = arith.constant 0 : index
    %11 = vector.load %arg2[%c0_12, %c0_13] : memref<24x1xf32, #tpu.memory_space<vmem>>, vector<24x1xf32>
    %12 = vector.broadcast %11 : vector<24x1xf32> to vector<24x128xf32>
    %13 = arith.addf %10, %12 : vector<24x128xf32>
    %14 = vector.extract_strided_slice %13 {offsets = [0, 0], sizes = [8, 128], strides = [1, 1]} : vector<24x128xf32> to vector<8x128xf32>
    %15 = vector.extract_strided_slice %13 {offsets = [8, 0], sizes = [8, 128], strides = [1, 1]} : vector<24x128xf32> to vector<8x128xf32>
    %16 = vector.extract_strided_slice %13 {offsets = [16, 0], sizes = [8, 128], strides = [1, 1]} : vector<24x128xf32> to vector<8x128xf32>
    %17 = math.tanh %14 : vector<8x128xf32>
    %18 = math.tanh %15 : vector<8x128xf32>
    %cst_14 = arith.constant 5.000000e-01 : f32
    %19 = vector.broadcast %cst_14 : f32 to vector<8x128xf32>
    %20 = arith.mulf %19, %18 : vector<8x128xf32>
    %cst_15 = arith.constant 5.000000e-01 : f32
    %21 = vector.broadcast %cst_15 : f32 to vector<8x128xf32>
    %22 = arith.addf %20, %21 : vector<8x128xf32>
    %23 = arith.mulf %17, %22 : vector<8x128xf32>
    %c0_16 = arith.constant 0 : index
    %c0_17 = arith.constant 0 : index
    %24 = vector.load %arg6[%c0_16, %c0_17] : memref<8x128xf32, #tpu.memory_space<vmem>>, vector<8x128xf32>
    tpu.vector_store %arg6[%c0_16, %c0_17], %23 {strides = array<i32>} : memref<8x128xf32, #tpu.memory_space<vmem>>, vector<8x128xf32>,
    %c0_18 = arith.constant 0 : index
    %c0_19 = arith.constant 0 : index
    %25 = vector.load %arg3[%c0_18, %c0_19] : memref<8x8xf32, #tpu.memory_space<vmem>>, vector<8x8xf32>
    %cst_20 = arith.constant dense<0.000000e+00> : vector<8x128xf32>
    %26 = tpu.matmul %25, %23, %cst_20 {dimension_numbers = #tpu.dot_dimension_numbers<[1], [0], [0], [1], [0, 0, 1, 1], [], []>} : vector<8x8xf32>, vector<8x128xf32>, vector<8x128xf32> -> vector<8x128xf32>
    %c0_21 = arith.constant 0 : index
    %c0_22 = arith.constant 0 : index
    %27 = vector.load %arg4[%c0_21, %c0_22] : memref<8x1xf32, #tpu.memory_space<vmem>>, vector<8x1xf32>
    %28 = vector.broadcast %27 : vector<8x1xf32> to vector<8x128xf32>
    %29 = arith.addf %28, %16 : vector<8x128xf32>
    %30 = arith.addf %26, %29 : vector<8x128xf32>
    %c0_23 = arith.constant 0 : index
    %c0_24 = arith.constant 0 : index
    %31 = vector.load %arg5[%c0_23, %c0_24] : memref<8x128xf32, #tpu.memory_space<vmem>>, vector<8x128xf32>
    tpu.vector_store %arg5[%c0_23, %c0_24], %30 {strides = array<i32>} : memref<8x128xf32, #tpu.memory_space<vmem>>, vector<8x128xf32>,
    return
  }
}

</mosaic_0001>

<bundles_post_ra>
// kernel: analog_gcn_block.1
= control target key start
LH: loop header
LB: loop body
LE: loop exit
PB: predicated region body
PF: predicated region fallthrough
CT: control target
= control target key end

     0   :  { %v167_v0 = vmov 0.0   ;;  %s168_s23 = smov 124   ;;  %s169_s24 = smov 126   ;;  %v170_v3 = vmov 0   ;;  %vm35_vm0 = vcmask 1010688   ;;  %vm30_vm1 = vcmask 1027072   ;;  %s239_s0 = inlined_call_operand.vmem [shape: f32[4,128], index: 0, kind: input, shape index: {}]   ;;  %s240_s2 = inlined_call_operand.vmem [shape: f32[24,1], index: 2, kind: input, shape index: {}]   ;;  %s241_s1 = inlined_call_operand.vmem [shape: f32[24,12], index: 1, kind: input, shape index: {}]   ;;  %s242_s4 = inlined_call_operand.vmem [shape: f32[8,1], index: 4, kind: input, shape index: {}]   ;;  %s243_s3 = inlined_call_operand.vmem [shape: f32[8,8], index: 3, kind: input, shape index: {}]   ;;  %s244_s6 = inlined_call_operand.vmem [shape: f32[8,128], index: 6, kind: output, shape index: {1}]   ;;  %s245_s5 = inlined_call_operand.vmem [shape: f32[8,128], index: 5, kind: output, shape index: {0}]  }
   0x1   :  { %22 = vst [vmem:[#allocation2] sm:$0xff] %v167_v0  ;;  %v24_v1 = vld [vmem:[%s239_s0] sm:$0xf]  ;;  %v43_v2 = vld [vmem:[%s240_s2 + $0x8] sm:$0xff]  ;;  %160 = vset.pattern.permute.xlu1 %v170_v3  ;;  %161 = vset.pattern.permute.xlu2 %v170_v3  ;;  %vm70_vm2 = vcmask 1043456   ;;  %vm60_vm3 = vcmask 97280  }
   0x2   :  { %32 = vrot.lane.b32.xlu0 %v24_v1, %s168_s23  ;;  %25 = vst [vmem:[#allocation2] sm:$0xf] %v24_v1  ;;  %52 = vperm.xlu1 %160, %v43_v2   ;;  %v42_v4 = vld [vmem:[%s240_s2] sm:$0xff]  ;;  %v38_v8 = vld [vmem:[%s241_s1 + $0x8] sm:$0xff]  ;;  %v39_v11 = vld [vmem:[%s241_s1 + $0x10] sm:$0xff]  ;;  %vm114_vm4 = vcmask 64512  }
   0x3   :  { %23 = vst [vmem:[#allocation2 + $0x8] sm:$0xf] %v167_v0  ;;  %162 = vset.pattern.permute.xlu0 %v170_v3  ;;  %v37_v10 = vld [vmem:[%s241_s1] sm:$0xff]  ;;  %v44_v12 = vld [vmem:[%s240_s2 + $0x10] sm:$0xff] }
   0x4   :  { %57 = vperm.xlu2 %161, %v44_v12   ;;  %v107_v14 = vld [vmem:[%s242_s4] sm:$0xff] }
   0x5   :  { %v106_v25 = vld [vmem:[%s243_s3] sm:$0xff] }
   0xa   :  { %27 = vrot.lane.b32.xlu0 %v24_v1, %s169_s24  ;;  %47 = vperm.xlu1 %160, %v42_v4  }
   0xc   :  { %110 = vperm.xlu2 %161, %v107_v14  }
  0x5e   :  { %v58_v26 = vpop.permute.xlu2 %57 }
  0x66   :  { %v111_v29 = vpop.permute.xlu2 %110 }
  0x74   :  { %v33_v5 = vpop.permute.xlu0 %32  ;;  %v53_v13 = vpop.permute.xlu1 %52 }
  0x75   :  { %36 = vst.msk [vmem:[#allocation2 + $0x8] sm:$0xf] %vm35_vm0, %v33_v5 }
  0x7c   :  { %v28_v6 = vpop.permute.xlu0 %27  ;;  %v41_v7 = vld [vmem:[#allocation2 + $0x8] sm:$0xf]  ;;  %v48_v15 = vpop.permute.xlu1 %47 }
  0x7d   :  { %31 = vst.msk [vmem:[#allocation2 + $0x4] sm:$0xf] %vm30_vm1, %v28_v6  ;;  %147 = vmatpush.msk.msra.mxu0 %vm70_vm2, %v41_v7  ;;  %152 = vmatpush.msk.msra.mxu2 %vm70_vm2, %v41_v7 }
  0x7e   :  { %153 = vmatpush.msk.msra.mxu3 %vm70_vm2, %v41_v7 }
  0x84   :  { %v40_v9 = vld [vmem:[#allocation2] sm:$0xff] }
  0x85   :  { %89 = vmatpush.msra.mxu0 %v40_v9  ;;  %154 = vmatpush.msra.mxu2 %v40_v9 }
  0x86   :  { %155 = vmatpush.msra.mxu3 %v40_v9  ;;  %149 = vmatmul.msk.f32.vlgmr.msra.gmra.mxu2 %vm60_vm3, %v38_v8 }
  0x87   :  { %148 = vmatmul.msk.f32.vlgmr.msra.gmra.mxu0 %vm60_vm3, %v37_v10  ;;  %150 = vmatmul.msk.f32.vlgmr.msra.gmra.mxu3 %vm60_vm3, %v39_v11 }
 0x104   :  { %v91_v16 = vpop.f32.mrf.mxu0 }
 0x105   :  { %v92_v19 = vadd.f32 %v91_v16, %v48_v15 }
 0x109   :  { %v94_v17 = vpop.f32.mrf.mxu2 }
 0x10a   :  { %v95_v18 = vadd.f32 %v94_v17, %v53_v13  ;;  %v97_v27 = vpop.f32.mrf.mxu3 }
 0x10b   :  { %v98_v28 = vadd.f32 %v97_v27, %v58_v26 }
 0x10c   :  { %163 = vtanh.f32 %v95_v18 }
 0x10d   :  { %165 = vtanh.f32 %v92_v19  ;;  %v113_v30 = vadd.f32 %v111_v29, %v98_v28 }
 0x112   :  { %v164_v20 = vpop.eup %163 }
 0x113   :  { %v102_v21 = vmul.f32 0.5, %v164_v20  ;;  %v166_v23 = vpop.eup %165 }
 0x115   :  { %v103_v22 = vadd.f32 0.5, %v102_v21 }
 0x117   :  { %v104_v24 = vmul.f32 %v166_v23, %v103_v22 }
 0x119   :  { %105 = vst [vmem:[%s244_s6] sm:$0xff] %v104_v24  ;;  %133 = vmatpush.msra.mxu1 %v104_v24 }
 0x11a   :  { %151 = vmatmul.msk.f32.vlgmr.msra.gmra.mxu1 %vm114_vm4, %v106_v25 }
 0x197   :  { %v135_v31 = vpop.f32.mrf.mxu1 }
 0x198   :  { %v136_v32 = vadd.f32 %v135_v31, %v113_v30 }
 0x19a   :  { %138 = vst [vmem:[%s245_s5] sm:$0xff] %v136_v32 }

</bundles_post_ra>
